<compile_context>
chip_gen: v7x
topology: tpu7x:2x2x1
jax: 0.10.0
libtpu: 0.0.40
codegen_flags: <defaults>
</compile_context>

<pallas_src>
import functools

import jax
import jax.numpy as jnp
from jax.experimental import pallas as pl
from jax.experimental.pallas import tpu as pltpu


def lstm_kernel(len_ref, x_ref, win_ref, whh_ref, b_ref, seq_ref, h_ref,
                *, hidden, seq_len, batch, n_par):
    """Fused forward pass of `n_par` parallel single-layer LSTMs.

    len_ref : (B, 1)          int32  valid length per batch element
    x_ref   : (B*T, n_in)     f32    batch-major input rows (row = b*T + t)
    win_ref : (n_in, 4*P*H)   f32    fused input->gate weights, gate-major cols
    whh_ref : (P*H, 4*P*H)    f32    block-diagonal hidden->gate weights
    b_ref   : (1, 4*P*H)      f32    fused combined bias (b_ih + b_hh)
    seq_ref : (B, T*P*H)      f32    per-step outputs, lane-dense, zero past len
    h_ref   : (B, P*H)        f32    hidden state at last valid timestep
    """
    ph = n_par * hidden
    lens = len_ref[...]                                    # (B, 1) int32

    # Hoisted input projection: ONE MXU matmul + bias for all timesteps of all
    # parallel LSTMs, completely off the serial recurrence critical path.
    xw = (jnp.dot(x_ref[...], win_ref[...],
                  preferred_element_type=jnp.float32)
          + b_ref[...])                                    # (B*T, 4*P*H)

    # Gather the per-step rows (b*T + t) before the loop — simple single-row
    # static slices + sublane concat, no per-step masked scratch loads.
    xts = []
    for t in range(seq_len):
        rows = [xw[b * seq_len + t:b * seq_len + t + 1, :] for b in range(batch)]
        xts.append(jnp.concatenate(rows, axis=0))          # (B, 4*P*H)

    # Precompute all packed-sequence masks once (no per-step re-broadcast).
    masks = [jnp.broadcast_to(t < lens, (batch, ph)) for t in range(seq_len)]

    whh = whh_ref[...]                                     # loop-invariant

    h = jnp.zeros((batch, ph), jnp.float32)
    c = jnp.zeros((batch, ph), jnp.float32)
    outs = []

    # Fully-unrolled time loop (T small & fixed): only the fused h @ Whh_bd,
    # two full-vreg EUP passes and the elementwise state update remain inside
    # the recurrence.
    for t in range(seq_len):
        gates = xts[t] + jnp.dot(h, whh,
                                 preferred_element_type=jnp.float32)  # (B, 4PH)
        # Full-lane nonlinearities, then cheap gate-major lane slices.
        sig = jax.nn.sigmoid(gates)
        tnh = jnp.tanh(gates)
        i_g = sig[:, 0 * ph:1 * ph]
        f_g = sig[:, 1 * ph:2 * ph]
        g_g = tnh[:, 2 * ph:3 * ph]
        o_g = sig[:, 3 * ph:4 * ph]

        c_new = f_g * c + i_g * g_g
        h_new = o_g * jnp.tanh(c_new)

        m = masks[t]
        outs.append(jnp.where(m, h_new, 0.0))              # zero past length
        h = jnp.where(m, h_new, h)                         # freeze past length
        c = jnp.where(m, c_new, c)

    # Single lane-dense writeback: last dim T*P*H is a multiple of 128.
    seq_ref[...] = jnp.concatenate(outs, axis=-1)
    h_ref[...] = h


def rnn_block_forward(seq, lengths, wih_t, whh_t, bias):
    """Mirrors RnnBlock.forward for the LSTM config above.

    seq     : (B, T, n_in) float32 (batch-first, like PyTorch)
    lengths : (B,)         int     (sorted descending, like enforce_sorted)
    wih_t   : (P, n_in, 4H)   (PyTorch weight_ih_l0 transposed)
    whh_t   : (P, H, 4H)      (PyTorch weight_hh_l0 transposed)
    bias    : (P, 1, 4H)      (b_ih + b_hh)
    returns (seq_out (B, T, P*H), h_out (B, P*H)); h_out squeezed if B==1,
    matching torch's x.squeeze(0).
    """
    B, T, n_in = seq.shape
    P = wih_t.shape[0]
    H = whh_t.shape[1]
    PH = P * H
    G = 4 * PH

    # Batch-major contiguous view — no wrapper-side transpose / HBM round trip.
    x2d = seq.reshape(B * T, n_in)
    lens = lengths.astype(jnp.int32).reshape(B, 1)

    # Gate-major fused column layout: column j = gate*P*H + p*H + h
    # (gate order i, f, g, o as in PyTorch).
    w_in = jnp.transpose(wih_t.reshape(P, n_in, 4, H),
                         (1, 2, 0, 3)).reshape(n_in, G)
    b_fused = jnp.transpose(bias.reshape(P, 4, H), (1, 0, 2)).reshape(1, G)

    # Block-diagonal recurrent weights: one (B, P*H) @ (P*H, 4*P*H) matmul per
    # step feeds both parallel LSTMs (zero off-diagonal blocks are free).
    whh_r = whh_t.reshape(P, H, 4, H)                      # (p, h_in, gate, h_out)
    whh_bd = jnp.einsum('pigo,pq->pigqo', whh_r,
                        jnp.eye(P, dtype=whh_t.dtype)).reshape(PH, G)

    grid_spec = pltpu.PrefetchScalarGridSpec(
        num_scalar_prefetch=0,
        grid=(1,),
        in_specs=[
            pl.BlockSpec((B, 1), lambda i: (0, 0)),
            pl.BlockSpec((B * T, n_in), lambda i: (0, 0)),
            pl.BlockSpec((n_in, G), lambda i: (0, 0)),
            pl.BlockSpec((PH, G), lambda i: (0, 0)),
            pl.BlockSpec((1, G), lambda i: (0, 0)),
        ],
        out_specs=[
            pl.BlockSpec((B, T * PH), lambda i: (0, 0)),
            pl.BlockSpec((B, PH), lambda i: (0, 0)),
        ],
    )

    seq_flat, h_out = pl.pallas_call(
        functools.partial(lstm_kernel, hidden=H, seq_len=T, batch=B, n_par=P),
        out_shape=(
            jax.ShapeDtypeStruct((B, T * PH), jnp.float32),
            jax.ShapeDtypeStruct((B, PH), jnp.float32),
        ),
        grid_spec=grid_spec,
        compiler_params=pltpu.CompilerParams(
            dimension_semantics=("arbitrary",)),
    )(lens, x2d, w_in, whh_bd, b_fused)

    seq_out = seq_flat.reshape(B, T, PH)                   # free contiguous view
    if B == 1:                                             # torch's x.squeeze(0)
        h_out = jnp.squeeze(h_out, axis=0)
    return seq_out, h_out


def rnn_block_reference(seq, lengths, wih_t, whh_t, bias):
    """Pure-JAX reference (packed-sequence LSTM semantics)."""
    B, T, _ = seq.shape
    P = wih_t.shape[0]
    H = whh_t.shape[1]
    lens = lengths.astype(jnp.int32)
    hp = jax.lax.Precision.HIGHEST
    seq_outs, h_outs = [], []
    for p in range(P):
        h = jnp.zeros((B, H), jnp.float32)
        c = jnp.zeros((B, H), jnp.float32)
        outs = []
        for t in range(T):
            x_t = seq[:, t, :]
            g = (jnp.dot(x_t, wih_t[p], precision=hp) + bias[p]
                 + jnp.dot(h, whh_t[p], precision=hp))
            i_g = jax.nn.sigmoid(g[:, 0 * H:1 * H])
            f_g = jax.nn.sigmoid(g[:, 1 * H:2 * H])
            g_g = jnp.tanh(g[:, 2 * H:3 * H])
            o_g = jax.nn.sigmoid(g[:, 3 * H:4 * H])
            c_new = f_g * c + i_g * g_g
            h_new = o_g * jnp.tanh(c_new)
            mask = (t < lens)[:, None]
            outs.append(jnp.where(mask, h_new, 0.0))
            h = jnp.where(mask, h_new, h)
            c = jnp.where(mask, c_new, c)
        seq_outs.append(jnp.stack(outs, axis=1))
        h_outs.append(h)
    seq_out = jnp.concatenate(seq_outs, axis=-1)
    h_out = jnp.concatenate(h_outs, axis=-1)
    if B == 1:
        h_out = jnp.squeeze(h_out, axis=0)
    return seq_out, h_out


def init_params(key, n_parallel, n_in, hidden):
    """Deterministic synthetic LSTM parameters (PyTorch shapes, then transposed)."""
    keys = jax.random.split(key, 4)
    bound = 1.0 / jnp.sqrt(hidden)
    # PyTorch layout: weight_ih (4H, n_in), weight_hh (4H, H), biases (4H,)
    w_ih = jax.random.uniform(keys[0], (n_parallel, 4 * hidden, n_in),
                              jnp.float32, -bound, bound)
    w_hh = jax.random.uniform(keys[1], (n_parallel, 4 * hidden, hidden),
                              jnp.float32, -bound, bound)
    b_ih = jax.random.uniform(keys[2], (n_parallel, 4 * hidden),
                              jnp.float32, -bound, bound)
    b_hh = jax.random.uniform(keys[3], (n_parallel, 4 * hidden),
                              jnp.float32, -bound, bound)
    wih_t = jnp.transpose(w_ih, (0, 2, 1))                 # (P, n_in, 4H)
    whh_t = jnp.transpose(w_hh, (0, 2, 1))                 # (P, H, 4H)
    bias = (b_ih + b_hh)[:, None, :]                       # (P, 1, 4H)
    return wih_t, whh_t, bias


if __name__ == "__main__":
    B, T, N_IN, HIDDEN, N_PARALLEL = 2, 8, 16, 32, 2

    key = jax.random.PRNGKey(0)
    k_x, k_p = jax.random.split(key)
    seq = jax.random.normal(k_x, (B, T, N_IN), jnp.float32)
    lengths = jnp.array([8, 5], dtype=jnp.int32)           # sorted descending
    wih_t, whh_t, bias = init_params(k_p, N_PARALLEL, N_IN, HIDDEN)

    fwd = jax.jit(rnn_block_forward)
    seq_out, h_out = fwd(seq, lengths, wih_t, whh_t, bias)
    jax.block_until_ready((seq_out, h_out))

    assert seq_out.shape == (B, T, N_PARALLEL * HIDDEN)
    assert h_out.shape == (B, N_PARALLEL * HIDDEN)
    # Padded positions must be exactly zero (pad_packed_sequence semantics).
    assert bool(jnp.all(seq_out[1, 5:, :] == 0.0))

    # Numerical check against a pure-JAX reference (reference uses HIGHEST
    # precision; kernel uses default MXU precision with f32 accumulation).
    ref_seq, ref_h = rnn_block_reference(seq, lengths, wih_t, whh_t, bias)
    assert bool(jnp.allclose(seq_out, ref_seq, atol=2e-3, rtol=2e-3))
    assert bool(jnp.allclose(h_out, ref_h, atol=2e-3, rtol=2e-3))

    print("KERNEL_OK")
</pallas_src>

<mosaic_0001>
module attributes {stable_mosaic.version = 11 : i64} {
  func.func @lstm_kernel(%arg0: i32, %arg1: memref<2x1xi32, #tpu.memory_space<vmem>>, %arg2: memref<16x16xf32, #tpu.memory_space<vmem>>, %arg3: memref<16x256xf32, #tpu.memory_space<vmem>>, %arg4: memref<64x256xf32, #tpu.memory_space<vmem>>, %arg5: memref<1x256xf32, #tpu.memory_space<vmem>>, %arg6: memref<2x512xf32, #tpu.memory_space<vmem>>, %arg7: memref<2x64xf32, #tpu.memory_space<vmem>>) attributes {dimension_semantics = [#tpu.dimension_semantics<arbitrary>], iteration_bounds = array<i64: 1>, scalar_prefetch = 0 : i64, scratch_operands = 0 : i64, tpu.core_type = #tpu.core_type<tc>, window_params = [{pipeline_mode = #tpu.pipeline_mode<synchronous>, transform_indices = @transform_0, window_bounds = array<i64: 2, 1>}, {pipeline_mode = #tpu.pipeline_mode<synchronous>, transform_indices = @transform_1, window_bounds = array<i64: 16, 16>}, {pipeline_mode = #tpu.pipeline_mode<synchronous>, transform_indices = @transform_2, window_bounds = array<i64: 16, 256>}, {pipeline_mode = #tpu.pipeline_mode<synchronous>, transform_indices = @transform_3, window_bounds = array<i64: 64, 256>}, {pipeline_mode = #tpu.pipeline_mode<synchronous>, transform_indices = @transform_4, window_bounds = array<i64: 1, 256>}, {pipeline_mode = #tpu.pipeline_mode<synchronous>, transform_indices = @transform_5, window_bounds = array<i64: 2, 512>}, {pipeline_mode = #tpu.pipeline_mode<synchronous>, transform_indices = @transform_6, window_bounds = array<i64: 2, 64>}]} {
    %c0 = arith.constant 0 : index
    %c0_0 = arith.constant 0 : index
    %0 = vector.load %arg1[%c0, %c0_0] : memref<2x1xi32, #tpu.memory_space<vmem>>, vector<2x1xi32>
    %c0_1 = arith.constant 0 : index
    %c0_2 = arith.constant 0 : index
    %1 = vector.load %arg2[%c0_1, %c0_2] : memref<16x16xf32, #tpu.memory_space<vmem>>, vector<16x16xf32>
    %c0_3 = arith.constant 0 : index
    %c0_4 = arith.constant 0 : index
    %2 = vector.load %arg3[%c0_3, %c0_4] : memref<16x256xf32, #tpu.memory_space<vmem>>, vector<16x256xf32>
    %cst = arith.constant dense<0.000000e+00> : vector<16x256xf32>
    %3 = tpu.matmul %1, %2, %cst {dimension_numbers = #tpu.dot_dimension_numbers<[1], [0], [0], [1], [0, 0, 1, 1], [], []>} : vector<16x16xf32>, vector<16x256xf32>, vector<16x256xf32> -> vector<16x256xf32>
    %c0_5 = arith.constant 0 : index
    %c0_6 = arith.constant 0 : index
    %4 = vector.load %arg5[%c0_5, %c0_6] : memref<1x256xf32, #tpu.memory_space<vmem>>, vector<1x256xf32>
    %5 = vector.broadcast %4 : vector<1x256xf32> to vector<16x256xf32>
    %6 = arith.addf %3, %5 : vector<16x256xf32>
    %7 = vector.extract_strided_slice %6 {offsets = [0, 0], sizes = [1, 256], strides = [1, 1]} : vector<16x256xf32> to vector<1x256xf32>
    %8 = vector.extract_strided_slice %6 {offsets = [8, 0], sizes = [1, 256], strides = [1, 1]} : vector<16x256xf32> to vector<1x256xf32>
    %9 = tpu.concatenate %7, %8 in 0 : vector<1x256xf32>, vector<1x256xf32> -> vector<2x256xf32>
    %10 = vector.extract_strided_slice %6 {offsets = [1, 0], sizes = [1, 256], strides = [1, 1]} : vector<16x256xf32> to vector<1x256xf32>
    %11 = vector.extract_strided_slice %6 {offsets = [9, 0], sizes = [1, 256], strides = [1, 1]} : vector<16x256xf32> to vector<1x256xf32>
    %12 = tpu.concatenate %10, %11 in 0 : vector<1x256xf32>, vector<1x256xf32> -> vector<2x256xf32>
    %13 = vector.extract_strided_slice %6 {offsets = [2, 0], sizes = [1, 256], strides = [1, 1]} : vector<16x256xf32> to vector<1x256xf32>
    %14 = vector.extract_strided_slice %6 {offsets = [10, 0], sizes = [1, 256], strides = [1, 1]} : vector<16x256xf32> to vector<1x256xf32>
    %15 = tpu.concatenate %13, %14 in 0 : vector<1x256xf32>, vector<1x256xf32> -> vector<2x256xf32>
    %16 = vector.extract_strided_slice %6 {offsets = [3, 0], sizes = [1, 256], strides = [1, 1]} : vector<16x256xf32> to vector<1x256xf32>
    %17 = vector.extract_strided_slice %6 {offsets = [11, 0], sizes = [1, 256], strides = [1, 1]} : vector<16x256xf32> to vector<1x256xf32>
    %18 = tpu.concatenate %16, %17 in 0 : vector<1x256xf32>, vector<1x256xf32> -> vector<2x256xf32>
    %19 = vector.extract_strided_slice %6 {offsets = [4, 0], sizes = [1, 256], strides = [1, 1]} : vector<16x256xf32> to vector<1x256xf32>
    %20 = vector.extract_strided_slice %6 {offsets = [12, 0], sizes = [1, 256], strides = [1, 1]} : vector<16x256xf32> to vector<1x256xf32>
    %21 = tpu.concatenate %19, %20 in 0 : vector<1x256xf32>, vector<1x256xf32> -> vector<2x256xf32>
    %22 = vector.extract_strided_slice %6 {offsets = [5, 0], sizes = [1, 256], strides = [1, 1]} : vector<16x256xf32> to vector<1x256xf32>
    %23 = vector.extract_strided_slice %6 {offsets = [13, 0], sizes = [1, 256], strides = [1, 1]} : vector<16x256xf32> to vector<1x256xf32>
    %24 = tpu.concatenate %22, %23 in 0 : vector<1x256xf32>, vector<1x256xf32> -> vector<2x256xf32>
    %25 = vector.extract_strided_slice %6 {offsets = [6, 0], sizes = [1, 256], strides = [1, 1]} : vector<16x256xf32> to vector<1x256xf32>
    %26 = vector.extract_strided_slice %6 {offsets = [14, 0], sizes = [1, 256], strides = [1, 1]} : vector<16x256xf32> to vector<1x256xf32>
    %27 = tpu.concatenate %25, %26 in 0 : vector<1x256xf32>, vector<1x256xf32> -> vector<2x256xf32>
    %28 = vector.extract_strided_slice %6 {offsets = [7, 0], sizes = [1, 256], strides = [1, 1]} : vector<16x256xf32> to vector<1x256xf32>
    %29 = vector.extract_strided_slice %6 {offsets = [15, 0], sizes = [1, 256], strides = [1, 1]} : vector<16x256xf32> to vector<1x256xf32>
    %30 = tpu.concatenate %28, %29 in 0 : vector<1x256xf32>, vector<1x256xf32> -> vector<2x256xf32>
    %c0_i32 = arith.constant 0 : i32
    %31 = vector.broadcast %c0_i32 : i32 to vector<2x1xi32>
    %32 = arith.cmpi sgt, %0, %31 : vector<2x1xi32>
    %33 = vector.shape_cast %32 : vector<2x1xi1> to vector<2x1xi1>
    %34 = vector.broadcast %33 : vector<2x1xi1> to vector<2x64xi1>
    %c1_i32 = arith.constant 1 : i32
    %35 = vector.broadcast %c1_i32 : i32 to vector<2x1xi32>
    %36 = arith.cmpi sgt, %0, %35 : vector<2x1xi32>
    %37 = vector.shape_cast %36 : vector<2x1xi1> to vector<2x1xi1>
    %38 = vector.broadcast %37 : vector<2x1xi1> to vector<2x64xi1>
    %c2_i32 = arith.constant 2 : i32
    %39 = vector.broadcast %c2_i32 : i32 to vector<2x1xi32>
    %40 = arith.cmpi sgt, %0, %39 : vector<2x1xi32>
    %41 = vector.shape_cast %40 : vector<2x1xi1> to vector<2x1xi1>
    %42 = vector.broadcast %41 : vector<2x1xi1> to vector<2x64xi1>
    %c3_i32 = arith.constant 3 : i32
    %43 = vector.broadcast %c3_i32 : i32 to vector<2x1xi32>
    %44 = arith.cmpi sgt, %0, %43 : vector<2x1xi32>
    %45 = vector.shape_cast %44 : vector<2x1xi1> to vector<2x1xi1>
    %46 = vector.broadcast %45 : vector<2x1xi1> to vector<2x64xi1>
    %c4_i32 = arith.constant 4 : i32
    %47 = vector.broadcast %c4_i32 : i32 to vector<2x1xi32>
    %48 = arith.cmpi sgt, %0, %47 : vector<2x1xi32>
    %49 = vector.shape_cast %48 : vector<2x1xi1> to vector<2x1xi1>
    %50 = vector.broadcast %49 : vector<2x1xi1> to vector<2x64xi1>
    %c5_i32 = arith.constant 5 : i32
    %51 = vector.broadcast %c5_i32 : i32 to vector<2x1xi32>
    %52 = arith.cmpi sgt, %0, %51 : vector<2x1xi32>
    %53 = vector.shape_cast %52 : vector<2x1xi1> to vector<2x1xi1>
    %54 = vector.broadcast %53 : vector<2x1xi1> to vector<2x64xi1>
    %c6_i32 = arith.constant 6 : i32
    %55 = vector.broadcast %c6_i32 : i32 to vector<2x1xi32>
    %56 = arith.cmpi sgt, %0, %55 : vector<2x1xi32>
    %57 = vector.shape_cast %56 : vector<2x1xi1> to vector<2x1xi1>
    %58 = vector.broadcast %57 : vector<2x1xi1> to vector<2x64xi1>
    %c7_i32 = arith.constant 7 : i32
    %59 = vector.broadcast %c7_i32 : i32 to vector<2x1xi32>
    %60 = arith.cmpi sgt, %0, %59 : vector<2x1xi32>
    %61 = vector.shape_cast %60 : vector<2x1xi1> to vector<2x1xi1>
    %62 = vector.broadcast %61 : vector<2x1xi1> to vector<2x64xi1>
    %c0_7 = arith.constant 0 : index
    %c0_8 = arith.constant 0 : index
    %63 = vector.load %arg4[%c0_7, %c0_8] : memref<64x256xf32, #tpu.memory_space<vmem>>, vector<64x256xf32>
    %cst_9 = arith.constant 0.000000e+00 : f32
    %64 = vector.broadcast %cst_9 : f32 to vector<2x64xf32>
    %cst_10 = arith.constant 0.000000e+00 : f32
    %65 = vector.broadcast %cst_10 : f32 to vector<2x64xf32>
    %cst_11 = arith.constant dense<0.000000e+00> : vector<2x256xf32>
    %66 = tpu.matmul %64, %63, %cst_11 {dimension_numbers = #tpu.dot_dimension_numbers<[1], [0], [0], [1], [0, 0, 1, 1], [], []>} : vector<2x64xf32>, vector<64x256xf32>, vector<2x256xf32> -> vector<2x256xf32>
    %67 = arith.addf %9, %66 : vector<2x256xf32>
    %68 = arith.negf %67 : vector<2x256xf32>
    %69 = math.exp %68 : vector<2x256xf32>
    %cst_12 = arith.constant 1.000000e+00 : f32
    %70 = vector.broadcast %cst_12 : f32 to vector<2x256xf32>
    %71 = arith.addf %70, %69 : vector<2x256xf32>
    %72 = arith.divf %70, %71 : vector<2x256xf32>
    %73 = math.tanh %67 : vector<2x256xf32>
    %74 = vector.extract_strided_slice %72 {offsets = [0, 0], sizes = [2, 64], strides = [1, 1]} : vector<2x256xf32> to vector<2x64xf32>
    %75 = vector.extract_strided_slice %72 {offsets = [0, 64], sizes = [2, 64], strides = [1, 1]} : vector<2x256xf32> to vector<2x64xf32>
    %76 = vector.extract_strided_slice %73 {offsets = [0, 128], sizes = [2, 64], strides = [1, 1]} : vector<2x256xf32> to vector<2x64xf32>
    %77 = vector.extract_strided_slice %72 {offsets = [0, 192], sizes = [2, 64], strides = [1, 1]} : vector<2x256xf32> to vector<2x64xf32>
    %78 = arith.mulf %75, %65 : vector<2x64xf32>
    %79 = arith.mulf %74, %76 : vector<2x64xf32>
    %80 = arith.addf %78, %79 : vector<2x64xf32>
    %81 = math.tanh %80 : vector<2x64xf32>
    %82 = arith.mulf %77, %81 : vector<2x64xf32>
    %cst_13 = arith.constant 0.000000e+00 : f32
    %83 = vector.broadcast %cst_13 : f32 to vector<2x64xf32>
    %84 = arith.select %34, %82, %83 : vector<2x64xi1>, vector<2x64xf32>
    %85 = arith.select %34, %82, %64 : vector<2x64xi1>, vector<2x64xf32>
    %86 = arith.select %34, %80, %65 : vector<2x64xi1>, vector<2x64xf32>
    %cst_14 = arith.constant dense<0.000000e+00> : vector<2x256xf32>
    %87 = tpu.matmul %85, %63, %cst_14 {dimension_numbers = #tpu.dot_dimension_numbers<[1], [0], [0], [1], [0, 0, 1, 1], [], []>} : vector<2x64xf32>, vector<64x256xf32>, vector<2x256xf32> -> vector<2x256xf32>
    %88 = arith.addf %12, %87 : vector<2x256xf32>
    %89 = arith.negf %88 : vector<2x256xf32>
    %90 = math.exp %89 : vector<2x256xf32>
    %cst_15 = arith.constant 1.000000e+00 : f32
    %91 = vector.broadcast %cst_15 : f32 to vector<2x256xf32>
    %92 = arith.addf %91, %90 : vector<2x256xf32>
    %93 = arith.divf %91, %92 : vector<2x256xf32>
    %94 = math.tanh %88 : vector<2x256xf32>
    %95 = vector.extract_strided_slice %93 {offsets = [0, 0], sizes = [2, 64], strides = [1, 1]} : vector<2x256xf32> to vector<2x64xf32>
    %96 = vector.extract_strided_slice %93 {offsets = [0, 64], sizes = [2, 64], strides = [1, 1]} : vector<2x256xf32> to vector<2x64xf32>
    %97 = vector.extract_strided_slice %94 {offsets = [0, 128], sizes = [2, 64], strides = [1, 1]} : vector<2x256xf32> to vector<2x64xf32>
    %98 = vector.extract_strided_slice %93 {offsets = [0, 192], sizes = [2, 64], strides = [1, 1]} : vector<2x256xf32> to vector<2x64xf32>
    %99 = arith.mulf %96, %86 : vector<2x64xf32>
    %100 = arith.mulf %95, %97 : vector<2x64xf32>
    %101 = arith.addf %99, %100 : vector<2x64xf32>
    %102 = math.tanh %101 : vector<2x64xf32>
    %103 = arith.mulf %98, %102 : vector<2x64xf32>
    %cst_16 = arith.constant 0.000000e+00 : f32
    %104 = vector.broadcast %cst_16 : f32 to vector<2x64xf32>
    %105 = arith.select %38, %103, %104 : vector<2x64xi1>, vector<2x64xf32>
    %106 = arith.select %38, %103, %85 : vector<2x64xi1>, vector<2x64xf32>
    %107 = arith.select %38, %101, %86 : vector<2x64xi1>, vector<2x64xf32>
    %cst_17 = arith.constant dense<0.000000e+00> : vector<2x256xf32>
    %108 = tpu.matmul %106, %63, %cst_17 {dimension_numbers = #tpu.dot_dimension_numbers<[1], [0], [0], [1], [0, 0, 1, 1], [], []>} : vector<2x64xf32>, vector<64x256xf32>, vector<2x256xf32> -> vector<2x256xf32>
    %109 = arith.addf %15, %108 : vector<2x256xf32>
    %110 = arith.negf %109 : vector<2x256xf32>
    %111 = math.exp %110 : vector<2x256xf32>
    %cst_18 = arith.constant 1.000000e+00 : f32
    %112 = vector.broadcast %cst_18 : f32 to vector<2x256xf32>
    %113 = arith.addf %112, %111 : vector<2x256xf32>
    %114 = arith.divf %112, %113 : vector<2x256xf32>
    %115 = math.tanh %109 : vector<2x256xf32>
    %116 = vector.extract_strided_slice %114 {offsets = [0, 0], sizes = [2, 64], strides = [1, 1]} : vector<2x256xf32> to vector<2x64xf32>
    %117 = vector.extract_strided_slice %114 {offsets = [0, 64], sizes = [2, 64], strides = [1, 1]} : vector<2x256xf32> to vector<2x64xf32>
    %118 = vector.extract_strided_slice %115 {offsets = [0, 128], sizes = [2, 64], strides = [1, 1]} : vector<2x256xf32> to vector<2x64xf32>
    %119 = vector.extract_strided_slice %114 {offsets = [0, 192], sizes = [2, 64], strides = [1, 1]} : vector<2x256xf32> to vector<2x64xf32>
    %120 = arith.mulf %117, %107 : vector<2x64xf32>
    %121 = arith.mulf %116, %118 : vector<2x64xf32>
    %122 = arith.addf %120, %121 : vector<2x64xf32>
    %123 = math.tanh %122 : vector<2x64xf32>
    %124 = arith.mulf %119, %123 : vector<2x64xf32>
    %cst_19 = arith.constant 0.000000e+00 : f32
    %125 = vector.broadcast %cst_19 : f32 to vector<2x64xf32>
    %126 = arith.select %42, %124, %125 : vector<2x64xi1>, vector<2x64xf32>
    %127 = arith.select %42, %124, %106 : vector<2x64xi1>, vector<2x64xf32>
    %128 = arith.select %42, %122, %107 : vector<2x64xi1>, vector<2x64xf32>
    %cst_20 = arith.constant dense<0.000000e+00> : vector<2x256xf32>
    %129 = tpu.matmul %127, %63, %cst_20 {dimension_numbers = #tpu.dot_dimension_numbers<[1], [0], [0], [1], [0, 0, 1, 1], [], []>} : vector<2x64xf32>, vector<64x256xf32>, vector<2x256xf32> -> vector<2x256xf32>
    %130 = arith.addf %18, %129 : vector<2x256xf32>
    %131 = arith.negf %130 : vector<2x256xf32>
    %132 = math.exp %131 : vector<2x256xf32>
    %cst_21 = arith.constant 1.000000e+00 : f32
    %133 = vector.broadcast %cst_21 : f32 to vector<2x256xf32>
    %134 = arith.addf %133, %132 : vector<2x256xf32>
    %135 = arith.divf %133, %134 : vector<2x256xf32>
    %136 = math.tanh %130 : vector<2x256xf32>
    %137 = vector.extract_strided_slice %135 {offsets = [0, 0], sizes = [2, 64], strides = [1, 1]} : vector<2x256xf32> to vector<2x64xf32>
    %138 = vector.extract_strided_slice %135 {offsets = [0, 64], sizes = [2, 64], strides = [1, 1]} : vector<2x256xf32> to vector<2x64xf32>
    %139 = vector.extract_strided_slice %136 {offsets = [0, 128], sizes = [2, 64], strides = [1, 1]} : vector<2x256xf32> to vector<2x64xf32>
    %140 = vector.extract_strided_slice %135 {offsets = [0, 192], sizes = [2, 64], strides = [1, 1]} : vector<2x256xf32> to vector<2x64xf32>
    %141 = arith.mulf %138, %128 : vector<2x64xf32>
    %142 = arith.mulf %137, %139 : vector<2x64xf32>
    %143 = arith.addf %141, %142 : vector<2x64xf32>
    %144 = math.tanh %143 : vector<2x64xf32>
    %145 = arith.mulf %140, %144 : vector<2x64xf32>
    %cst_22 = arith.constant 0.000000e+00 : f32
    %146 = vector.broadcast %cst_22 : f32 to vector<2x64xf32>
    %147 = arith.select %46, %145, %146 : vector<2x64xi1>, vector<2x64xf32>
    %148 = arith.select %46, %145, %127 : vector<2x64xi1>, vector<2x64xf32>
    %149 = arith.select %46, %143, %128 : vector<2x64xi1>, vector<2x64xf32>
    %cst_23 = arith.constant dense<0.000000e+00> : vector<2x256xf32>
    %150 = tpu.matmul %148, %63, %cst_23 {dimension_numbers = #tpu.dot_dimension_numbers<[1], [0], [0], [1], [0, 0, 1, 1], [], []>} : vector<2x64xf32>, vector<64x256xf32>, vector<2x256xf32> -> vector<2x256xf32>
    %151 = arith.addf %21, %150 : vector<2x256xf32>
    %152 = arith.negf %151 : vector<2x256xf32>
    %153 = math.exp %152 : vector<2x256xf32>
    %cst_24 = arith.constant 1.000000e+00 : f32
    %154 = vector.broadcast %cst_24 : f32 to vector<2x256xf32>
    %155 = arith.addf %154, %153 : vector<2x256xf32>
    %156 = arith.divf %154, %155 : vector<2x256xf32>
    %157 = math.tanh %151 : vector<2x256xf32>
    %158 = vector.extract_strided_slice %156 {offsets = [0, 0], sizes = [2, 64], strides = [1, 1]} : vector<2x256xf32> to vector<2x64xf32>
    %159 = vector.extract_strided_slice %156 {offsets = [0, 64], sizes = [2, 64], strides = [1, 1]} : vector<2x256xf32> to vector<2x64xf32>
    %160 = vector.extract_strided_slice %157 {offsets = [0, 128], sizes = [2, 64], strides = [1, 1]} : vector<2x256xf32> to vector<2x64xf32>
    %161 = vector.extract_strided_slice %156 {offsets = [0, 192], sizes = [2, 64], strides = [1, 1]} : vector<2x256xf32> to vector<2x64xf32>
    %162 = arith.mulf %159, %149 : vector<2x64xf32>
    %163 = arith.mulf %158, %160 : vector<2x64xf32>
    %164 = arith.addf %162, %163 : vector<2x64xf32>
    %165 = math.tanh %164 : vector<2x64xf32>
    %166 = arith.mulf %161, %165 : vector<2x64xf32>
    %cst_25 = arith.constant 0.000000e+00 : f32
    %167 = vector.broadcast %cst_25 : f32 to vector<2x64xf32>
    %168 = arith.select %50, %166, %167 : vector<2x64xi1>, vector<2x64xf32>
    %169 = arith.select %50, %166, %148 : vector<2x64xi1>, vector<2x64xf32>
    %170 = arith.select %50, %164, %149 : vector<2x64xi1>, vector<2x64xf32>
    %cst_26 = arith.constant dense<0.000000e+00> : vector<2x256xf32>
    %171 = tpu.matmul %169, %63, %cst_26 {dimension_numbers = #tpu.dot_dimension_numbers<[1], [0], [0], [1], [0, 0, 1, 1], [], []>} : vector<2x64xf32>, vector<64x256xf32>, vector<2x256xf32> -> vector<2x256xf32>
    %172 = arith.addf %24, %171 : vector<2x256xf32>
    %173 = arith.negf %172 : vector<2x256xf32>
    %174 = math.exp %173 : vector<2x256xf32>
    %cst_27 = arith.constant 1.000000e+00 : f32
    %175 = vector.broadcast %cst_27 : f32 to vector<2x256xf32>
    %176 = arith.addf %175, %174 : vector<2x256xf32>
    %177 = arith.divf %175, %176 : vector<2x256xf32>
    %178 = math.tanh %172 : vector<2x256xf32>
    %179 = vector.extract_strided_slice %177 {offsets = [0, 0], sizes = [2, 64], strides = [1, 1]} : vector<2x256xf32> to vector<2x64xf32>
    %180 = vector.extract_strided_slice %177 {offsets = [0, 64], sizes = [2, 64], strides = [1, 1]} : vector<2x256xf32> to vector<2x64xf32>
    %181 = vector.extract_strided_slice %178 {offsets = [0, 128], sizes = [2, 64], strides = [1, 1]} : vector<2x256xf32> to vector<2x64xf32>
    %182 = vector.extract_strided_slice %177 {offsets = [0, 192], sizes = [2, 64], strides = [1, 1]} : vector<2x256xf32> to vector<2x64xf32>
    %183 = arith.mulf %180, %170 : vector<2x64xf32>
    %184 = arith.mulf %179, %181 : vector<2x64xf32>
    %185 = arith.addf %183, %184 : vector<2x64xf32>
    %186 = math.tanh %185 : vector<2x64xf32>
    %187 = arith.mulf %182, %186 : vector<2x64xf32>
    %cst_28 = arith.constant 0.000000e+00 : f32
    %188 = vector.broadcast %cst_28 : f32 to vector<2x64xf32>
    %189 = arith.select %54, %187, %188 : vector<2x64xi1>, vector<2x64xf32>
    %190 = arith.select %54, %187, %169 : vector<2x64xi1>, vector<2x64xf32>
    %191 = arith.select %54, %185, %170 : vector<2x64xi1>, vector<2x64xf32>
    %cst_29 = arith.constant dense<0.000000e+00> : vector<2x256xf32>
    %192 = tpu.matmul %190, %63, %cst_29 {dimension_numbers = #tpu.dot_dimension_numbers<[1], [0], [0], [1], [0, 0, 1, 1], [], []>} : vector<2x64xf32>, vector<64x256xf32>, vector<2x256xf32> -> vector<2x256xf32>
    %193 = arith.addf %27, %192 : vector<2x256xf32>
    %194 = arith.negf %193 : vector<2x256xf32>
    %195 = math.exp %194 : vector<2x256xf32>
    %cst_30 = arith.constant 1.000000e+00 : f32
    %196 = vector.broadcast %cst_30 : f32 to vector<2x256xf32>
    %197 = arith.addf %196, %195 : vector<2x256xf32>
    %198 = arith.divf %196, %197 : vector<2x256xf32>
    %199 = math.tanh %193 : vector<2x256xf32>
    %200 = vector.extract_strided_slice %198 {offsets = [0, 0], sizes = [2, 64], strides = [1, 1]} : vector<2x256xf32> to vector<2x64xf32>
    %201 = vector.extract_strided_slice %198 {offsets = [0, 64], sizes = [2, 64], strides = [1, 1]} : vector<2x256xf32> to vector<2x64xf32>
    %202 = vector.extract_strided_slice %199 {offsets = [0, 128], sizes = [2, 64], strides = [1, 1]} : vector<2x256xf32> to vector<2x64xf32>
    %203 = vector.extract_strided_slice %198 {offsets = [0, 192], sizes = [2, 64], strides = [1, 1]} : vector<2x256xf32> to vector<2x64xf32>
    %204 = arith.mulf %201, %191 : vector<2x64xf32>
    %205 = arith.mulf %200, %202 : vector<2x64xf32>
    %206 = arith.addf %204, %205 : vector<2x64xf32>
    %207 = math.tanh %206 : vector<2x64xf32>
    %208 = arith.mulf %203, %207 : vector<2x64xf32>
    %cst_31 = arith.constant 0.000000e+00 : f32
    %209 = vector.broadcast %cst_31 : f32 to vector<2x64xf32>
    %210 = arith.select %58, %208, %209 : vector<2x64xi1>, vector<2x64xf32>
    %211 = arith.select %58, %208, %190 : vector<2x64xi1>, vector<2x64xf32>
    %212 = arith.select %58, %206, %191 : vector<2x64xi1>, vector<2x64xf32>
    %cst_32 = arith.constant dense<0.000000e+00> : vector<2x256xf32>
    %213 = tpu.matmul %211, %63, %cst_32 {dimension_numbers = #tpu.dot_dimension_numbers<[1], [0], [0], [1], [0, 0, 1, 1], [], []>} : vector<2x64xf32>, vector<64x256xf32>, vector<2x256xf32> -> vector<2x256xf32>
    %214 = arith.addf %30, %213 : vector<2x256xf32>
    %215 = arith.negf %214 : vector<2x256xf32>
    %216 = math.exp %215 : vector<2x256xf32>
    %cst_33 = arith.constant 1.000000e+00 : f32
    %217 = vector.broadcast %cst_33 : f32 to vector<2x256xf32>
    %218 = arith.addf %217, %216 : vector<2x256xf32>
    %219 = arith.divf %217, %218 : vector<2x256xf32>
    %220 = math.tanh %214 : vector<2x256xf32>
    %221 = vector.extract_strided_slice %219 {offsets = [0, 0], sizes = [2, 64], strides = [1, 1]} : vector<2x256xf32> to vector<2x64xf32>
    %222 = vector.extract_strided_slice %219 {offsets = [0, 64], sizes = [2, 64], strides = [1, 1]} : vector<2x256xf32> to vector<2x64xf32>
    %223 = vector.extract_strided_slice %220 {offsets = [0, 128], sizes = [2, 64], strides = [1, 1]} : vector<2x256xf32> to vector<2x64xf32>
    %224 = vector.extract_strided_slice %219 {offsets = [0, 192], sizes = [2, 64], strides = [1, 1]} : vector<2x256xf32> to vector<2x64xf32>
    %225 = arith.mulf %222, %212 : vector<2x64xf32>
    %226 = arith.mulf %221, %223 : vector<2x64xf32>
    %227 = arith.addf %225, %226 : vector<2x64xf32>
    %228 = math.tanh %227 : vector<2x64xf32>
    %229 = arith.mulf %224, %228 : vector<2x64xf32>
    %cst_34 = arith.constant 0.000000e+00 : f32
    %230 = vector.broadcast %cst_34 : f32 to vector<2x64xf32>
    %231 = arith.select %62, %229, %230 : vector<2x64xi1>, vector<2x64xf32>
    %232 = arith.select %62, %229, %211 : vector<2x64xi1>, vector<2x64xf32>
    %233 = tpu.concatenate %84, %105, %126, %147, %168, %189, %210, %231 in 1 : vector<2x64xf32>, vector<2x64xf32>, vector<2x64xf32>, vector<2x64xf32>, vector<2x64xf32>, vector<2x64xf32>, vector<2x64xf32>, vector<2x64xf32> -> vector<2x512xf32>
    %c0_35 = arith.constant 0 : index
    %c0_36 = arith.constant 0 : index
    %234 = vector.load %arg6[%c0_35, %c0_36] : memref<2x512xf32, #tpu.memory_space<vmem>>, vector<2x512xf32>
    tpu.vector_store %arg6[%c0_35, %c0_36], %233 {strides = array<i32>} : memref<2x512xf32, #tpu.memory_space<vmem>>, vector<2x512xf32>,
    %c0_37 = arith.constant 0 : index
    %c0_38 = arith.constant 0 : index
    %235 = vector.load %arg7[%c0_37, %c0_38] : memref<2x64xf32, #tpu.memory_space<vmem>>, vector<2x64xf32>
    tpu.vector_store %arg7[%c0_37, %c0_38], %232 {strides = array<i32>} : memref<2x64xf32, #tpu.memory_space<vmem>>, vector<2x64xf32>,
    return
  }
  func.func @transform_0(%arg0: i32) -> (i32, i32) {
    %c0_i32 = arith.constant 0 : i32
    %c0_i32_0 = arith.constant 0 : i32
    %c0_i32_1 = arith.constant 0 : i32
    return %c0_i32, %c0_i32_0 : i32, i32
  }
  func.func @transform_1(%arg0: i32) -> (i32, i32) {
    %c0_i32 = arith.constant 0 : i32
    %c0_i32_0 = arith.constant 0 : i32
    %c0_i32_1 = arith.constant 0 : i32
    return %c0_i32, %c0_i32_0 : i32, i32
  }
  func.func @transform_2(%arg0: i32) -> (i32, i32) {
    %c0_i32 = arith.constant 0 : i32
    %c0_i32_0 = arith.constant 0 : i32
    %c0_i32_1 = arith.constant 0 : i32
    return %c0_i32, %c0_i32_0 : i32, i32
  }
  func.func @transform_3(%arg0: i32) -> (i32, i32) {
    %c0_i32 = arith.constant 0 : i32
    %c0_i32_0 = arith.constant 0 : i32
    %c0_i32_1 = arith.constant 0 : i32
    return %c0_i32, %c0_i32_0 : i32, i32
  }
  func.func @transform_4(%arg0: i32) -> (i32, i32) {
    %c0_i32 = arith.constant 0 : i32
    %c0_i32_0 = arith.constant 0 : i32
    %c0_i32_1 = arith.constant 0 : i32
    return %c0_i32, %c0_i32_0 : i32, i32
  }
  func.func @transform_5(%arg0: i32) -> (i32, i32) {
    %c0_i32 = arith.constant 0 : i32
    %c0_i32_0 = arith.constant 0 : i32
    %c0_i32_1 = arith.constant 0 : i32
    return %c0_i32, %c0_i32_0 : i32, i32
  }
  func.func @transform_6(%arg0: i32) -> (i32, i32) {
    %c0_i32 = arith.constant 0 : i32
    %c0_i32_0 = arith.constant 0 : i32
    %c0_i32_1 = arith.constant 0 : i32
    return %c0_i32, %c0_i32_0 : i32, i32
  }
}

</mosaic_0001>

<bundles_post_ra>
// kernel: rnn_block_forward.1
= control target key start
LH: loop header
LB: loop body
LE: loop exit
PB: predicated region body
PF: predicated region fallthrough
CT: control target
= control target key end

     0   :  { %v1436_v7 = vmov 0.0   ;;  %vm42_vm0 = vcmask 130048   ;;  %s1788_s0 = inlined_call_operand.vmem [shape: s32[2,1], index: 0, kind: input, shape index: {}]   ;;  %s1789_s1 = inlined_call_operand.vmem [shape: f32[16,16], index: 1, kind: input, shape index: {}]   ;;  %s1790_s2 = inlined_call_operand.vmem [shape: f32[16,256], index: 2, kind: input, shape index: {}]   ;;  %s1791_s3 = inlined_call_operand.vmem [shape: f32[64,256], index: 3, kind: input, shape index: {}]   ;;  %s1792_s4 = inlined_call_operand.vmem [shape: f32[1,256], index: 4, kind: input, shape index: {}]   ;;  %s1793_s5 = inlined_call_operand.vmem [shape: f32[2,512], index: 5, kind: output, shape index: {0}]   ;;  %s1794_s6 = inlined_call_operand.hbm [shape: f32[2,64], index: 6, kind: output, shape index: {1}]  }
   0x1   :  { %v27_v0 = vld [vmem:[%s1790_s2 + $0x8] sm:$0xff]  ;;  %v29_v1 = vld [vmem:[%s1790_s2 + $0x18] sm:$0xff]  ;;  %v26_v5 = vld [vmem:[%s1790_s2] sm:$0xff]  ;;  %113 = vmatprep.mubr.f32.mxu0 %v1436_v7  ;;  %335 = vmatprep.mubr.f32.mxu1 %v1436_v7 }
   0x2   :  { %v252_v2 = vld [vmem:[%s1791_s3 + $0x8] sm:$0xff]  ;;  %v1177_v3 = vpack.c.bf16 %v29_v1, %v27_v0  ;;  %v254_v4 = vld [vmem:[%s1791_s3 + $0x18] sm:$0xff]  ;;  %v28_v6 = vld [vmem:[%s1790_s2 + $0x10] sm:$0xff] }
   0x3   :  { %v1496_v8 = vpack.c.bf16 %v254_v4, %v252_v2  ;;  %v1179_v9 = vpack.c.bf16 %v28_v6, %v26_v5  ;;  %v251_v10 = vld [vmem:[%s1791_s3] sm:$0xff]  ;;  %v253_v11 = vld [vmem:[%s1791_s3 + $0x10] sm:$0xff]  ;;  %v256_v13 = vld [vmem:[%s1791_s3 + $0x28] sm:$0xff] }
   0x4   :  { %1178 = vmatprep.subr.bf16.mxu0 %v1177_v3  ;;  %v1504_v12 = vpack.c.bf16 %v253_v11, %v251_v10  ;;  %v258_v14 = vld [vmem:[%s1791_s3 + $0x38] sm:$0xff]  ;;  %v255_v15 = vld [vmem:[%s1791_s3 + $0x20] sm:$0xff]  ;;  %v257_v18 = vld [vmem:[%s1791_s3 + $0x30] sm:$0xff] }
   0x5   :  { %1182 = vmatprep.subr.bf16.mxu1 %v1496_v8  ;;  %1180 = vmatpush1.bf16.msra.mxu0 %v1179_v9  ;;  %v24_v16 = vld [vmem:[%s1789_s1] sm:$0xff]  ;;  %v1519_v17 = vpack.c.bf16 %v258_v14, %v256_v13  ;;  %v260_v19 = vld [vmem:[%s1791_s3 + $0x48] sm:$0xff]  ;;  %v1528_v20 = vpack.c.bf16 %v257_v18, %v255_v15  ;;  %v262_v21 = vld [vmem:[%s1791_s3 + $0x58] sm:$0xff] }
   0x6   :  { %1184 = vmatpush1.bf16.msra.mxu1 %v1504_v12  ;;  %1198 = vmatprep.subr.bf16.mxu0 %v1496_v8  ;;  %v1535_v22 = vpack.c.bf16 %v262_v21, %v260_v19  ;;  %v259_v23 = vld [vmem:[%s1791_s3 + $0x40] sm:$0xff]  ;;  %v261_v24 = vld [vmem:[%s1791_s3 + $0x50] sm:$0xff]  ;;  %v264_v25 = vld [vmem:[%s1791_s3 + $0x68] sm:$0xff] }
   0x7   :  { %1186 = vmatprep.subr.bf16.mxu1 %v1519_v17  ;;  %v266_v26 = vld [vmem:[%s1791_s3 + $0x78] sm:$0xff] }
   0x8   :  { %1152 = vmatmul.mubr.msk.f32.vlgmr.msra.gmra.mrb[0].mxu0 %vm42_vm0, %v24_v16 }
   0x9   :  { %12 = vsyncpa [#allocation3], 0  ;;  %119 = vmatprep.mubr.f32.mxu0 %v1436_v7  ;;  %v25_v27 = vld [vmem:[%s1789_s1 + $0x8] sm:$0xff]  ;;  %1200 = vmatpush1.bf16.msra.mxu0 %v1504_v12  ;;  %v1556_v28 = vpack.c.bf16 %v261_v24, %v259_v23  ;;  %v1560_v29 = vpack.c.bf16 %v266_v26, %v264_v25  ;;  %v263_v30 = vld [vmem:[%s1791_s3 + $0x60] sm:$0xff]  ;;  %v1437_v33 = vmov 0   ;;  %v32_v34 = vlaneseq  ;;  %s1438_s16 = smov 64  }
   0xa   :  { %1188 = vmatpush1.bf16.msra.mxu1 %v1528_v20  ;;  %1202 = vmatprep.subr.bf16.mxu0 %v1519_v17  ;;  %v265_v31 = vld [vmem:[%s1791_s3 + $0x70] sm:$0xff]  ;;  %v30_v37 = vld [vmem:[%s1792_s4] sm:$0x3]  ;;  %vm132_vm1 = vcmask 1040384   ;;  %vm267_vm4 = vcmask 523264   ;;  %s1440_s18 = smov [#allocation2]  }
   0xb   :  { %1190 = vmatprep.subr.bf16.mxu1 %v1535_v22  ;;  %v1572_v32 = vpack.c.bf16 %v265_v31, %v263_v30  ;;  %1314 = vset.pattern.permute.xlu0 %v1437_v33  ;;  %v1594_v35 = vshrl.u32 %v32_v34, 7  ;;  %s1142_s19 = sshll.u32 %s1440_s18, 4  ;;  %s1143_s19 = int_to_ptr.vmem [resolvable:$true] %s1142_s19 }
   0xc   :  { %1153 = vmatmul.mubr.msk.f32.gmra.mrb[2].mxu0 %vm42_vm0, %v25_v27  ;;  %1315 = vset.pattern.permute.xlu1 %v1437_v33  ;;  %s1412_s20 = scalar_lea.vmem %s1143_s19, 32  ;;  %p1417_p1 = scmp.lt.s32.totalorder %s1143_s19, %s1143_s19 }
   0xd   :  { %1204 = vmatpush1.bf16.msra.mxu0 %v1528_v20  ;;  %437 = vmatprep.mubr.f32.mxu0 %v1436_v7  ;;  %v34_v36 = vsub.s32 0, %v1594_v35  ;;  %v38_v38 = vsub.s32 1, %v1594_v35  ;;  %p1413_p0 = scmp.ne.s32.totalorder %s1143_s19, %s1412_s20  ;;  %p1418_p2 = scmp.lt.s32.totalorder %s1412_s20, %s1412_s20 }
   0xe   :  { %1192 = vmatpush1.bf16.msra.mxu1 %v1556_v28  ;;  %1206 = vmatprep.subr.bf16.mxu0 %v1535_v22 }
   0xf   :  { %1194 = vmatprep.subr.bf16.mxu1 %v1560_v29  ;;  %v35_v39 = vrot.slane %v30_v37, %v34_v36  ;;  %v39_v40 = vrot.slane %v30_v37, %v38_v38  ;;  %p1419_p3 = por %p1418_p2, %p1417_p1 }
  0x11   :  { %1208 = vmatpush1.bf16.msra.mxu0 %v1556_v28  ;;  %p1420_p4 = pnand %p1419_p3, %p1413_p0 }
  0x12   :  { %1196 = vmatpush1.bf16.msra.mxu1 %v1572_v32  ;;  %1210 = vmatprep.subr.bf16.mxu0 %v1560_v29 }
  0x13   :  { %1214 = vmatprep.subr.bf16.mxu1 %v1496_v8 }
  0x15   :  { %336 = vmatmul.mubr.f32.vlgmr.msra.gmra.mrb[0].mxu1 %v1436_v7  ;;  %1212 = vmatpush1.bf16.msra.mxu0 %v1572_v32 }
  0x16   :  { %1216 = vmatpush1.bf16.msra.mxu1 %v1504_v12  ;;  %540 = vmatprep.mubr.f32.mxu1 %v1436_v7 }
  0x17   :  { %1218 = vmatprep.subr.bf16.mxu1 %v1519_v17  ;;  %1230 = vmatprep.subr.bf16.mxu0 %v1496_v8 }
  0x1a   :  { %1220 = vmatpush1.bf16.msra.mxu1 %v1528_v20 }
  0x1b   :  { %1222 = vmatprep.subr.bf16.mxu1 %v1535_v22 }
  0x1e   :  { %1224 = vmatpush1.bf16.msra.mxu1 %v1556_v28 }
  0x1f   :  { %1226 = vmatprep.subr.bf16.mxu1 %v1560_v29 }
  0x22   :  { %1228 = vmatpush1.bf16.msra.mxu1 %v1572_v32 }
  0x23   :  { %1246 = vmatprep.subr.bf16.mxu1 %v1496_v8 }
  0xdb   :  { %v115_v41 = vpop.f32.mrb[0].mxu0 }
  0xdc   :  { %v116_v42 = vadd.f32 %v115_v41, %v35_v39  ;;  %v117_v43 = vpop.f32.mrb[1].mxu0 }
  0xdd   :  { %v118_v44 = vadd.f32 %v117_v43, %v39_v40 }
  0xde   :  { %v137_v45 = vrot.slane %v116_v42, 1  ;;  %v143_v46 = vrot.slane %v116_v42, 2  ;;  %v153_v47 = vrot.slane %v116_v42, 3  ;;  %v163_v48 = vrot.slane %v116_v42, 4 }
  0xdf   :  { %v121_v49 = vpop.f32.mrb[2].mxu0  ;;  %v138_v50 = vrot.slane %v118_v44, 1  ;;  %v144_v51 = vrot.slane %v118_v44, 2  ;;  %v154_v52 = vrot.slane %v118_v44, 3  ;;  %v164_v53 = vrot.slane %v118_v44, 4 }
  0xe0   :  { %v122_v54 = vadd.f32 %v121_v49, %v35_v39  ;;  %v123_v55 = vpop.f32.mrb[3].mxu0  ;;  %v173_v56 = vrot.slane %v116_v42, 5  ;;  %v174_v57 = vrot.slane %v118_v44, 5  ;;  %v183_v58 = vrot.slane %v116_v42, 6 }
  0xe1   :  { %v124_v59 = vadd.f32 %v123_v55, %v39_v40  ;;  %v184_v60 = vrot.slane %v118_v44, 6  ;;  %v193_v61 = vrot.slane %v116_v42, 7  ;;  %v194_v62 = vrot.slane %v118_v44, 7 }
  0xe2   :  { %v128_v63 = vrot.slane %v122_v54, 7  ;;  %v1602_v0 = vsel %vm132_vm1, %v137_v45, %v122_v54  ;;  %v147_v1 = vrot.slane %v122_v54, 1  ;;  %v157_v2 = vrot.slane %v122_v54, 2 }
  0xe3   :  { %v129_v3 = vrot.slane %v124_v59, 7  ;;  %v1605_v4 = vsel %vm132_vm1, %v138_v50, %v124_v59  ;;  %v148_v5 = vrot.slane %v124_v59, 1  ;;  %v158_v6 = vrot.slane %v124_v59, 2 }
  0xe4   :  { %v133_v9 = vsel %vm132_vm1, %v116_v42, %v128_v63  ;;  %v1609_v10 = vsel %vm132_vm1, %v143_v46, %v147_v1  ;;  %v1612_v11 = vsel %vm132_vm1, %v153_v47, %v157_v2  ;;  %v167_v13 = vrot.slane %v122_v54, 3  ;;  %v1648_v47 = vld [vmem:[%s1788_s0] sm:$0x3] }
  0xe5   :  { %v134_v14 = vsel %vm132_vm1, %v118_v44, %v129_v3  ;;  %v1616_v15 = vsel %vm132_vm1, %v144_v51, %v148_v5  ;;  %v1619_v16 = vsel %vm132_vm1, %v154_v52, %v158_v6  ;;  %v168_v18 = vrot.slane %v124_v59, 3 }
  0xe6   :  { %v1622_v19 = vsel %vm132_vm1, %v163_v48, %v167_v13  ;;  %v177_v21 = vrot.slane %v122_v54, 4  ;;  %v178_v23 = vrot.slane %v124_v59, 4  ;;  %v187_v24 = vrot.slane %v122_v54, 5 }
  0xe7   :  { %v1625_v25 = vsel %vm132_vm1, %v164_v53, %v168_v18  ;;  %v188_v26 = vrot.slane %v124_v59, 5  ;;  %v197_v27 = vrot.slane %v122_v54, 6  ;;  %v198_v30 = vrot.slane %v124_v59, 6 }
  0xe8   :  { %v337_v31 = vpop.f32.mrb[0].mxu1  ;;  %v1628_v34 = vsel %vm132_vm1, %v173_v56, %v177_v21  ;;  %v1631_v36 = vsel %vm132_vm1, %v174_v57, %v178_v23  ;;  %v1634_v37 = vsel %vm132_vm1, %v183_v58, %v187_v24  ;;  %vm203_vm2 = vcmp.gt.s32.totalorder %v1648_v47, 0 }
  0xe9   :  { %v342_v38 = vadd.f32 %v337_v31, %v133_v9  ;;  %v339_v39 = vpop.f32.mrb[1].mxu1  ;;  %v1637_v40 = vsel %vm132_vm1, %v184_v60, %v188_v26  ;;  %v1640_v41 = vsel %vm132_vm1, %v193_v61, %v197_v27  ;;  %v1643_v42 = vsel %vm132_vm1, %v194_v62, %v198_v30 }
  0xea   :  { %v343_v43 = vadd.f32 %v339_v39, %v134_v14  ;;  %v204_v51 = vsel %vm203_vm2, 1, %v1437_v33  ;;  %vm209_vm5 = vcmp.gt.s32.totalorder %v1648_v47, 1  ;;  %vm215_vm7 = vcmp.gt.s32.totalorder %v1648_v47, 2 }
  0xeb   :  { %v1154_v44 = vmul.f32 -1.442695, %v342_v38  ;;  %v210_v24 = vsel %vm209_vm5, 1, %v1437_v33  ;;  %vm221_vm9 = vcmp.gt.s32.totalorder %v1648_v47, 3  ;;  %vm227_vm11 = vcmp.gt.s32.totalorder %v1648_v47, 4 }
  0xec   :  { %v1155_v52 = vmul.f32 -1.442695, %v343_v43  ;;  %vm233_vm13 = vcmp.gt.s32.totalorder %v1648_v47, 5  ;;  %vm239_vm15 = vcmp.gt.s32.totalorder %v1648_v47, 6  ;;  %vm245_vm1 = vcmp.gt.s32.totalorder %v1648_v47, 7 }
  0xed   :  { %1316 = vpow2.f32 %v1154_v44 }
  0xee   :  { %1318 = vtanh.f32 %v343_v43 }
  0xf7   :  { %v1317_v45 = vpop.eup %1316 }
  0xf8   :  { %v350_v46 = vadd.f32 1.0, %v1317_v45  ;;  %v1319_v48 = vpop.eup %1318 }
  0xfa   :  { %1320 = vrcp.f32 %v350_v46 }
  0xfb   :  { %1322 = vpow2.f32 %v1155_v52 }
 0x104   :  { %v1321_v49 = vpop.eup %1320 }
 0x105   :  { %v358_v50 = vmul.f32 %v1321_v49, %v1319_v48  ;;  %v1323_v53 = vpop.eup %1322  ;;  %v357_v55 = vmul.f32 0.0, %v1321_v49  ;;  %v216_v49 = vsel %vm215_vm7, 1, %v1437_v33 }
 0x106   :  { %v351_v54 = vadd.f32 1.0, %v1323_v53 }
 0x107   :  { %360 = vrot.lane.b32.xlu0 %v358_v50, %s1438_s16 }
 0x108   :  { %1324 = vrcp.f32 %v351_v54 }
 0x10b   :  { %206 = vperm.xlu0 %1314, %v204_v51  }
 0x112   :  { %v1325_v58 = vpop.eup %1324 }
 0x179   :  { %v361_v56 = vpop.permute.xlu0 %360 }
 0x17a   :  { %v363_v57 = vadd.f32 %v361_v56, %v357_v55 }
 0x17c   :  { %1326 = vtanh.f32 %v363_v57 }
 0x186   :  { %v1327_v59 = vpop.eup %1326 }
 0x187   :  { %v365_v60 = vmul.f32 %v1327_v59, %v1325_v58 }
 0x18a   :  { %v207_v61 = vpop.permute.xlu0 %206 }
 0x18b   :  { %vm208_vm3 = vcmp.eq.s32.totalorder %v207_v61, 1 }
 0x18c   :  { %v367_v62 = vsel %vm208_vm3, %v363_v57, 0.0  ;;  %v366_v63 = vsel %vm208_vm3, %v365_v60, 0.0  ;;  %vm1132_vm3 = vcmask 517120  }
 0x18d   :  { %369 = vrot.lane.b32.xlu1 %v366_v63, %s1438_s16 }
 0x1ff   :  { %v1654_v1 = vpop.permute.xlu1 %369 }
 0x200   :  { %1156 = vmatmul.mubr.msk.f32.vlgmr.msra.gmra.mrb[4].mxu0 %vm267_vm4, %v1654_v1 }
 0x201   :  { %1232 = vmatpush1.bf16.msra.mxu0 %v1504_v12  ;;  %643 = vmatprep.mubr.f32.mxu0 %v1436_v7 }
 0x202   :  { %1234 = vmatprep.subr.bf16.mxu0 %v1519_v17 }
 0x205   :  { %1236 = vmatpush1.bf16.msra.mxu0 %v1528_v20 }
 0x206   :  { %1238 = vmatprep.subr.bf16.mxu0 %v1535_v22 }
 0x209   :  { %1240 = vmatpush1.bf16.msra.mxu0 %v1556_v28 }
 0x20a   :  { %1242 = vmatprep.subr.bf16.mxu0 %v1560_v29 }
 0x20d   :  { %1244 = vmatpush1.bf16.msra.mxu0 %v1572_v32 }
 0x20e   :  { %1262 = vmatprep.subr.bf16.mxu0 %v1496_v8 }
 0x2d3   :  { %v439_v2 = vpop.f32.mrb[4].mxu0 }
 0x2d4   :  { %v444_v3 = vadd.f32 %v439_v2, %v1602_v0  ;;  %v441_v5 = vpop.f32.mrb[5].mxu0 }
 0x2d5   :  { %v445_v6 = vadd.f32 %v441_v5, %v1605_v4 }
 0x2d6   :  { %v1157_v9 = vmul.f32 -1.442695, %v444_v3 }
 0x2d7   :  { %v1158_v0 = vmul.f32 -1.442695, %v445_v6 }
 0x2d8   :  { %1328 = vpow2.f32 %v1157_v9 }
 0x2d9   :  { %1330 = vtanh.f32 %v445_v6 }
 0x2e2   :  { %v1329_v13 = vpop.eup %1328 }
 0x2e3   :  { %v452_v14 = vadd.f32 1.0, %v1329_v13  ;;  %v1331_v18 = vpop.eup %1330 }
 0x2e5   :  { %1332 = vrcp.f32 %v452_v14 }
 0x2e6   :  { %1334 = vpow2.f32 %v1158_v0 }
 0x2ef   :  { %v1333_v21 = vpop.eup %1332 }
 0x2f0   :  { %v460_v23 = vmul.f32 %v1333_v21, %v1331_v18  ;;  %v1335_v26 = vpop.eup %1334  ;;  %v459_v27 = vmul.f32 %v1333_v21, %v367_v62  ;;  %v222_v21 = vsel %vm221_vm9, 1, %v1437_v33 }
 0x2f1   :  { %v453_v4 = vadd.f32 1.0, %v1335_v26 }
 0x2f2   :  { %462 = vrot.lane.b32.xlu1 %v460_v23, %s1438_s16 }
 0x2f3   :  { %1336 = vrcp.f32 %v453_v4 }
 0x2f6   :  { %212 = vperm.xlu1 %1315, %v210_v24  }
 0x2fd   :  { %v1337_v38 = vpop.eup %1336 }
 0x364   :  { %v463_v30 = vpop.permute.xlu1 %462 }
 0x365   :  { %v465_v31 = vadd.f32 %v463_v30, %v459_v27 }
 0x367   :  { %1338 = vtanh.f32 %v465_v31 }
 0x371   :  { %v1339_v39 = vpop.eup %1338 }
 0x372   :  { %v467_v43 = vmul.f32 %v1339_v39, %v1337_v38 }
 0x375   :  { %v213_v44 = vpop.permute.xlu1 %212 }
 0x376   :  { %vm214_vm6 = vcmp.eq.s32.totalorder %v213_v44, 1 }
 0x377   :  { %v1673_v45 = vsel %vm214_vm6, %v467_v43, 0.0  ;;  %v470_v46 = vsel %vm214_vm6, %v465_v31, %v367_v62  ;;  %v469_v48 = vsel %vm214_vm6, %v467_v43, %v366_v63 }
 0x378   :  { %472 = vrot.lane.b32.xlu0 %v469_v48, %s1438_s16 }
 0x37c   :  { %218 = vperm.xlu0 %1314, %v216_v49  }
 0x3ea   :  { %v473_v50 = vpop.permute.xlu0 %472 }
 0x3eb   :  { %1159 = vmatmul.mubr.msk.f32.vlgmr.msra.gmra.mrb[2].mxu1 %vm267_vm4, %v473_v50 }
 0x3ec   :  { %1248 = vmatpush1.bf16.msra.mxu1 %v1504_v12  ;;  %746 = vmatprep.mubr.f32.mxu1 %v1436_v7 }
 0x3ed   :  { %1250 = vmatprep.subr.bf16.mxu1 %v1519_v17 }
 0x3f0   :  { %1252 = vmatpush1.bf16.msra.mxu1 %v1528_v20 }
 0x3f1   :  { %1254 = vmatprep.subr.bf16.mxu1 %v1535_v22 }
 0x3f4   :  { %1256 = vmatpush1.bf16.msra.mxu1 %v1556_v28 }
 0x3f5   :  { %1258 = vmatprep.subr.bf16.mxu1 %v1560_v29 }
 0x3f8   :  { %1260 = vmatpush1.bf16.msra.mxu1 %v1572_v32 }
 0x3f9   :  { %1278 = vmatprep.subr.bf16.mxu1 %v1496_v8 }
 0x3fb   :  { %v219_v2 = vpop.permute.xlu0 %218 }
 0x3fc   :  { %vm220_vm8 = vcmp.eq.s32.totalorder %v219_v2, 1 }
 0x4be   :  { %v542_v51 = vpop.f32.mrb[2].mxu1 }
 0x4bf   :  { %v547_v52 = vadd.f32 %v542_v51, %v1609_v10  ;;  %v544_v53 = vpop.f32.mrb[3].mxu1 }
 0x4c0   :  { %v548_v54 = vadd.f32 %v544_v53, %v1616_v15 }
 0x4c1   :  { %v1160_v55 = vmul.f32 -1.442695, %v547_v52 }
 0x4c2   :  { %v1161_v61 = vmul.f32 -1.442695, %v548_v54 }
 0x4c3   :  { %1340 = vpow2.f32 %v1160_v55 }
 0x4c4   :  { %1342 = vtanh.f32 %v548_v54 }
 0x4cd   :  { %v1341_v56 = vpop.eup %1340 }
 0x4ce   :  { %v555_v57 = vadd.f32 1.0, %v1341_v56  ;;  %v1343_v58 = vpop.eup %1342  ;;  %v228_v56 = vsel %vm227_vm11, 1, %v1437_v33 }
 0x4d0   :  { %1344 = vrcp.f32 %v555_v57 }
 0x4d1   :  { %1346 = vpow2.f32 %v1161_v61 }
 0x4da   :  { %v1345_v59 = vpop.eup %1344 }
 0x4db   :  { %v563_v60 = vmul.f32 %v1345_v59, %v1343_v58  ;;  %v1347_v62 = vpop.eup %1346  ;;  %v562_v10 = vmul.f32 %v1345_v59, %v470_v46 }
 0x4dc   :  { %v556_v63 = vadd.f32 1.0, %v1347_v62 }
 0x4dd   :  { %565 = vrot.lane.b32.xlu1 %v563_v60, %s1438_s16 }
 0x4de   :  { %1348 = vrcp.f32 %v556_v63 }
 0x4e8   :  { %v1349_v6 = vpop.eup %1348 }
 0x54f   :  { %v566_v3 = vpop.permute.xlu1 %565 }
 0x550   :  { %v568_v5 = vadd.f32 %v566_v3, %v562_v10 }
 0x552   :  { %1350 = vtanh.f32 %v568_v5  ;;  %v573_v15 = vsel %vm220_vm8, %v568_v5, %v470_v46 }
 0x55c   :  { %v1351_v9 = vpop.eup %1350 }
 0x55d   :  { %v570_v13 = vmul.f32 %v1351_v9, %v1349_v6 }
 0x55f   :  { %v572_v14 = vsel %vm220_vm8, %v570_v13, %v469_v48  ;;  %v1691_v18 = vsel %vm220_vm8, %v570_v13, 0.0 }
 0x560   :  { %575 = vrot.lane.b32.xlu1 %v572_v14, %s1438_s16 }
 0x564   :  { %224 = vperm.xlu1 %1315, %v222_v21  }
 0x5d2   :  { %v576_v23 = vpop.permute.xlu1 %575 }
 0x5d3   :  { %1162 = vmatmul.mubr.msk.f32.vlgmr.msra.gmra.mrb[6].mxu0 %vm267_vm4, %v576_v23 }
 0x5d4   :  { %1264 = vmatpush1.bf16.msra.mxu0 %v1504_v12  ;;  %849 = vmatprep.mubr.f32.mxu0 %v1436_v7 }
 0x5d5   :  { %1266 = vmatprep.subr.bf16.mxu0 %v1519_v17 }
 0x5d8   :  { %1268 = vmatpush1.bf16.msra.mxu0 %v1528_v20 }
 0x5d9   :  { %1270 = vmatprep.subr.bf16.mxu0 %v1535_v22 }
 0x5dc   :  { %1272 = vmatpush1.bf16.msra.mxu0 %v1556_v28 }
 0x5dd   :  { %1274 = vmatprep.subr.bf16.mxu0 %v1560_v29 }
 0x5e0   :  { %1276 = vmatpush1.bf16.msra.mxu0 %v1572_v32 }
 0x5e1   :  { %1294 = vmatprep.subr.bf16.mxu0 %v1496_v8 }
 0x5e3   :  { %v225_v48 = vpop.permute.xlu1 %224 }
 0x5e4   :  { %vm226_vm10 = vcmp.eq.s32.totalorder %v225_v48, 1 }
 0x6a6   :  { %v645_v24 = vpop.f32.mrb[6].mxu0 }
 0x6a7   :  { %v650_v0 = vadd.f32 %v645_v24, %v1612_v11  ;;  %v647_v26 = vpop.f32.mrb[7].mxu0 }
 0x6a8   :  { %v651_v4 = vadd.f32 %v647_v26, %v1619_v16 }
 0x6a9   :  { %v1163_v27 = vmul.f32 -1.442695, %v650_v0 }
 0x6aa   :  { %v1164_v44 = vmul.f32 -1.442695, %v651_v4 }
 0x6ab   :  { %1352 = vpow2.f32 %v1163_v27  ;;  %v234_v27 = vsel %vm233_vm13, 1, %v1437_v33 }
 0x6ac   :  { %1354 = vtanh.f32 %v651_v4 }
 0x6b5   :  { %v1353_v30 = vpop.eup %1352 }
 0x6b6   :  { %v658_v31 = vadd.f32 1.0, %v1353_v30  ;;  %v1355_v38 = vpop.eup %1354 }
 0x6b8   :  { %1356 = vrcp.f32 %v658_v31 }
 0x6b9   :  { %1358 = vpow2.f32 %v1164_v44 }
 0x6c2   :  { %v1357_v39 = vpop.eup %1356 }
 0x6c3   :  { %v666_v43 = vmul.f32 %v1357_v39, %v1355_v38  ;;  %v1359_v8 = vpop.eup %1358  ;;  %v665_v11 = vmul.f32 %v1357_v39, %v573_v15 }
 0x6c4   :  { %v659_v46 = vadd.f32 1.0, %v1359_v8 }
 0x6c5   :  { %668 = vrot.lane.b32.xlu0 %v666_v43, %s1438_s16 }
 0x6c6   :  { %1360 = vrcp.f32 %v659_v46 }
 0x6d0   :  { %v1361_v51 = vpop.eup %1360 }
 0x737   :  { %v669_v49 = vpop.permute.xlu0 %668 }
 0x738   :  { %v671_v50 = vadd.f32 %v669_v49, %v665_v11 }
 0x73a   :  { %1362 = vtanh.f32 %v671_v50  ;;  %v676_v16 = vsel %vm226_vm10, %v671_v50, %v573_v15 }
 0x744   :  { %v1363_v52 = vpop.eup %1362 }
 0x745   :  { %v673_v53 = vmul.f32 %v1363_v52, %v1361_v51  ;;  %v240_v52 = vsel %vm239_vm15, 1, %v1437_v33 }
 0x747   :  { %v675_v54 = vsel %vm226_vm10, %v673_v53, %v572_v14  ;;  %v1709_v55 = vsel %vm226_vm10, %v673_v53, 0.0 }
 0x748   :  { %678 = vrot.lane.b32.xlu0 %v675_v54, %s1438_s16 }
 0x74c   :  { %230 = vperm.xlu0 %1314, %v228_v56  }
 0x7ba   :  { %v679_v57 = vpop.permute.xlu0 %678 }
 0x7bb   :  { %1165 = vmatmul.mubr.msk.f32.vlgmr.msra.gmra.mrb[4].mxu1 %vm267_vm4, %v679_v57 }
 0x7bc   :  { %1280 = vmatpush1.bf16.msra.mxu1 %v1504_v12  ;;  %952 = vmatprep.mubr.f32.mxu1 %v1436_v7 }
 0x7bd   :  { %1282 = vmatprep.subr.bf16.mxu1 %v1519_v17 }
 0x7c0   :  { %1284 = vmatpush1.bf16.msra.mxu1 %v1528_v20 }
 0x7c1   :  { %1286 = vmatprep.subr.bf16.mxu1 %v1535_v22 }
 0x7c4   :  { %1288 = vmatpush1.bf16.msra.mxu1 %v1556_v28 }
 0x7c5   :  { %1290 = vmatprep.subr.bf16.mxu1 %v1560_v29 }
 0x7c8   :  { %1292 = vmatpush1.bf16.msra.mxu1 %v1572_v32 }
 0x7cb   :  { %v231_v13 = vpop.permute.xlu0 %230 }
 0x7cc   :  { %vm232_vm12 = vcmp.eq.s32.totalorder %v231_v13, 1 }
 0x88e   :  { %v748_v58 = vpop.f32.mrb[4].mxu1 }
 0x88f   :  { %v753_v59 = vadd.f32 %v748_v58, %v1622_v19  ;;  %v750_v60 = vpop.f32.mrb[5].mxu1 }
 0x890   :  { %v754_v61 = vadd.f32 %v750_v60, %v1625_v25 }
 0x891   :  { %v1166_v62 = vmul.f32 -1.442695, %v753_v59 }
 0x892   :  { %v1167_v15 = vmul.f32 -1.442695, %v754_v61 }
 0x893   :  { %1364 = vpow2.f32 %v1166_v62 }
 0x894   :  { %1366 = vtanh.f32 %v754_v61 }
 0x89d   :  { %v1365_v63 = vpop.eup %1364 }
 0x89e   :  { %v761_v2 = vadd.f32 1.0, %v1365_v63  ;;  %v1367_v10 = vpop.eup %1366 }
 0x8a0   :  { %1368 = vrcp.f32 %v761_v2 }
 0x8a1   :  { %1370 = vpow2.f32 %v1167_v15 }
 0x8aa   :  { %v1369_v3 = vpop.eup %1368 }
 0x8ab   :  { %v769_v5 = vmul.f32 %v1369_v3, %v1367_v10  ;;  %v1371_v6 = vpop.eup %1370  ;;  %v768_v19 = vmul.f32 %v1369_v3, %v676_v16 }
 0x8ac   :  { %v762_v9 = vadd.f32 1.0, %v1371_v6 }
 0x8ad   :  { %771 = vrot.lane.b32.xlu1 %v769_v5, %s1438_s16 }
 0x8ae   :  { %1372 = vrcp.f32 %v762_v9 }
 0x8b8   :  { %v1373_v23 = vpop.eup %1372 }
 0x91f   :  { %v772_v14 = vpop.permute.xlu1 %771 }
 0x920   :  { %v774_v21 = vadd.f32 %v772_v14, %v768_v19 }
 0x922   :  { %1374 = vtanh.f32 %v774_v21  ;;  %v779_v25 = vsel %vm232_vm12, %v774_v21, %v676_v16 }
 0x92c   :  { %v1375_v24 = vpop.eup %1374 }
 0x92d   :  { %v776_v0 = vmul.f32 %v1375_v24, %v1373_v23  ;;  %v246_v23 = vsel %vm245_vm1, 1, %v1437_v33 }
 0x92f   :  { %v778_v26 = vsel %vm232_vm12, %v776_v0, %v675_v54  ;;  %v1726_v4 = vsel %vm232_vm12, %v776_v0, 0.0 }
 0x930   :  { %781 = vrot.lane.b32.xlu1 %v778_v26, %s1438_s16 }
 0x934   :  { %236 = vperm.xlu1 %1315, %v234_v27  }
 0x9a2   :  { %v782_v30 = vpop.permute.xlu1 %781 }
 0x9a3   :  { %1168 = vmatmul.mubr.msk.f32.vlgmr.msra.gmra.mrb[8].mxu0 %vm267_vm4, %v782_v30 }
 0x9a4   :  { %1296 = vmatpush1.bf16.msra.mxu0 %v1504_v12  ;;  %1055 = vmatprep.mubr.f32.mxu0 %v1436_v7 }
 0x9a5   :  { %1298 = vmatprep.subr.bf16.mxu0 %v1519_v17 }
 0x9a8   :  { %1300 = vmatpush1.bf16.msra.mxu0 %v1528_v20 }
 0x9a9   :  { %1302 = vmatprep.subr.bf16.mxu0 %v1535_v22 }
 0x9ac   :  { %1304 = vmatpush1.bf16.msra.mxu0 %v1556_v28 }
 0x9ad   :  { %1306 = vmatprep.subr.bf16.mxu0 %v1560_v29 }
 0x9b0   :  { %1308 = vmatpush1.bf16.msra.mxu0 %v1572_v32 }
 0x9b3   :  { %v237_v8 = vpop.permute.xlu1 %236 }
 0x9b4   :  { %vm238_vm14 = vcmp.eq.s32.totalorder %v237_v8, 1 }
 0xa76   :  { %v851_v31 = vpop.f32.mrb[8].mxu0 }
 0xa77   :  { %v856_v38 = vadd.f32 %v851_v31, %v1628_v34  ;;  %v853_v39 = vpop.f32.mrb[9].mxu0 }
 0xa78   :  { %v857_v12 = vadd.f32 %v853_v39, %v1631_v36 }
 0xa79   :  { %v1169_v43 = vmul.f32 -1.442695, %v856_v38 }
 0xa7a   :  { %v1170_v28 = vmul.f32 -1.442695, %v857_v12 }
 0xa7b   :  { %1376 = vpow2.f32 %v1169_v43 }
 0xa7c   :  { %1378 = vtanh.f32 %v857_v12 }
 0xa85   :  { %v1377_v7 = vpop.eup %1376 }
 0xa86   :  { %v864_v17 = vadd.f32 1.0, %v1377_v7  ;;  %v1379_v20 = vpop.eup %1378 }
 0xa88   :  { %1380 = vrcp.f32 %v864_v17 }
 0xa89   :  { %1382 = vpow2.f32 %v1170_v28 }
 0xa92   :  { %v1381_v22 = vpop.eup %1380 }
 0xa93   :  { %v872_v44 = vmul.f32 %v1381_v22, %v1379_v20  ;;  %v1383_v29 = vpop.eup %1382  ;;  %v871_v34 = vmul.f32 %v1381_v22, %v779_v25  ;;  %v1101_v22 = vsel %vm267_vm4, %v1654_v1, %v1673_v45 }
 0xa94   :  { %v865_v32 = vadd.f32 1.0, %v1383_v29  ;;  %v1439_v29 = vmov 1983009808  }
 0xa95   :  { %874 = vrot.lane.b32.xlu0 %v872_v44, %s1438_s16 }
 0xa96   :  { %1384 = vrcp.f32 %v865_v32  ;;  %v1112_v32 = vunpack.c.l.s4 %v1439_v29 }
 0xaa0   :  { %v1385_v11 = vpop.eup %1384 }
 0xb07   :  { %v875_v46 = vpop.permute.xlu0 %874 }
 0xb08   :  { %v877_v48 = vadd.f32 %v875_v46, %v871_v34  ;;  %v1113_v34 = vunpack.c.0.s8 %v1112_v32 }
 0xb0a   :  { %1386 = vtanh.f32 %v877_v48  ;;  %v882_v36 = vsel %vm238_vm14, %v877_v48, %v779_v25 }
 0xb14   :  { %v1387_v49 = vpop.eup %1386 }
 0xb15   :  { %v879_v50 = vmul.f32 %v1387_v49, %v1385_v11  ;;  %v1116_v11 = vsub.s32 %v1113_v34, %v1594_v35 }
 0xb17   :  { %v881_v16 = vsel %vm238_vm14, %v879_v50, %v778_v26  ;;  %v1743_v51 = vsel %vm238_vm14, %v879_v50, 0.0 }
 0xb18   :  { %884 = vrot.lane.b32.xlu0 %v881_v16, %s1438_s16 }
 0xb1c   :  { %242 = vperm.xlu0 %1314, %v240_v52  }
 0xb8a   :  { %v885_v53 = vpop.permute.xlu0 %884 }
 0xb8b   :  { %1171 = vmatmul.mubr.msk.f32.vlgmr.msra.gmra.mrb[6].mxu1 %vm267_vm4, %v885_v53 }
 0xb9b   :  { %v243_v15 = vpop.permute.xlu0 %242 }
 0xb9c   :  { %vm244_vm0 = vcmp.eq.s32.totalorder %v243_v15, 1 }
 0xc5e   :  { %v954_v54 = vpop.f32.mrb[6].mxu1 }
 0xc5f   :  { %v959_v56 = vadd.f32 %v954_v54, %v1634_v37  ;;  %v956_v57 = vpop.f32.mrb[7].mxu1 }
 0xc60   :  { %v960_v58 = vadd.f32 %v956_v57, %v1637_v40 }
 0xc61   :  { %v1172_v59 = vmul.f32 -1.442695, %v959_v56 }
 0xc62   :  { %v1173_v10 = vmul.f32 -1.442695, %v960_v58 }
 0xc63   :  { %1388 = vpow2.f32 %v1172_v59 }
 0xc64   :  { %1390 = vtanh.f32 %v960_v58 }
 0xc6d   :  { %v1389_v60 = vpop.eup %1388 }
 0xc6e   :  { %v967_v61 = vadd.f32 1.0, %v1389_v60  ;;  %v1391_v62 = vpop.eup %1390 }
 0xc70   :  { %1392 = vrcp.f32 %v967_v61 }
 0xc71   :  { %1394 = vpow2.f32 %v1173_v10 }
 0xc7a   :  { %v1393_v63 = vpop.eup %1392 }
 0xc7b   :  { %v975_v2 = vmul.f32 %v1393_v63, %v1391_v62  ;;  %v1395_v3 = vpop.eup %1394  ;;  %v974_v37 = vmul.f32 %v1393_v63, %v882_v36 }
 0xc7c   :  { %v968_v5 = vadd.f32 1.0, %v1395_v3 }
 0xc7d   :  { %977 = vrot.lane.b32.xlu1 %v975_v2, %s1438_s16 }
 0xc7e   :  { %1396 = vrcp.f32 %v968_v5 }
 0xc88   :  { %v1397_v13 = vpop.eup %1396 }
 0xcef   :  { %v978_v6 = vpop.permute.xlu1 %977 }
 0xcf0   :  { %v980_v9 = vadd.f32 %v978_v6, %v974_v37 }
 0xcf2   :  { %1398 = vtanh.f32 %v980_v9  ;;  %v985_v40 = vsel %vm244_vm0, %v980_v9, %v882_v36 }
 0xcfc   :  { %v1399_v19 = vpop.eup %1398 }
 0xcfd   :  { %v982_v14 = vmul.f32 %v1399_v19, %v1397_v13 }
 0xcff   :  { %v984_v21 = vsel %vm244_vm0, %v982_v14, %v881_v16  ;;  %v983_v25 = vsel %vm244_vm0, %v982_v14, 0.0 }
 0xd00   :  { %987 = vrot.lane.b32.xlu1 %v984_v21, %s1438_s16 }
 0xd04   :  { %248 = vperm.xlu1 %1315, %v246_v23  }
 0xd08   :  { %1094 = vrot.lane.b32.xlu1 %v1726_v4, %s1438_s16 }
 0xd72   :  { %v988_v24 = vpop.permute.xlu1 %987 }
 0xd73   :  { %1174 = vmatmul.mubr.msk.f32.vlgmr.msra.gmra.mrb[10].mxu0 %vm267_vm4, %v988_v24 }
 0xe46   :  { %v1057_v0 = vpop.f32.mrb[10].mxu0 }
 0xe47   :  { %v1062_v26 = vadd.f32 %v1057_v0, %v1640_v41  ;;  %v1059_v27 = vpop.f32.mrb[11].mxu0 }
 0xe48   :  { %v1063_v30 = vadd.f32 %v1059_v27, %v1643_v42 }
 0xe49   :  { %v1175_v47 = vmul.f32 -1.442695, %v1062_v26 }
 0xe4a   :  { %v1176_v41 = vmul.f32 -1.442695, %v1063_v30 }
 0xe4b   :  { %1400 = vpow2.f32 %v1175_v47 }
 0xe4c   :  { %1402 = vtanh.f32 %v1063_v30 }
 0xe55   :  { %v1401_v31 = vpop.eup %1400 }
 0xe56   :  { %v1070_v38 = vadd.f32 1.0, %v1401_v31  ;;  %v1403_v33 = vpop.eup %1402 }
 0xe58   :  { %1404 = vrcp.f32 %v1070_v38 }
 0xe59   :  { %1406 = vpow2.f32 %v1176_v41 }
 0xe62   :  { %v1405_v39 = vpop.eup %1404 }
 0xe63   :  { %v1078_v12 = vmul.f32 %v1405_v39, %v1403_v33  ;;  %v1077_v43 = vmul.f32 %v1405_v39, %v985_v40  ;;  %v1407_v42 = vpop.eup %1406 }
 0xe64   :  { %v1071_v4 = vadd.f32 1.0, %v1407_v42 }
 0xe65   :  { %1080 = vrot.lane.b32.xlu0 %v1078_v12, %s1438_s16 }
 0xe66   :  { %1408 = vrcp.f32 %v1071_v4 }
 0xe69   :  { %1090 = vrot.lane.b32.xlu0 %v1691_v18, %s1438_s16  ;;  %v249_v18 = vpop.permute.xlu1 %248 }
 0xe6a   :  { %vm250_vm2 = vcmp.eq.s32.totalorder %v249_v18, 1 }
 0xe6d   :  { %1098 = vrot.lane.b32.xlu0 %v983_v25, %s1438_s16  ;;  %v1095_v48 = vpop.permute.xlu1 %1094 }
 0xe6e   :  { %v1103_v1 = vsel %vm267_vm4, %v1095_v48, %v1743_v51 }
 0xe70   :  { %v1409_v8 = vpop.eup %1408 }
 0xed7   :  { %v1081_v7 = vpop.permute.xlu0 %1080 }
 0xed8   :  { %v1083_v17 = vadd.f32 %v1081_v7, %v1077_v43 }
 0xeda   :  { %1410 = vtanh.f32 %v1083_v17 }
 0xedb   :  { %v1091_v20 = vpop.permute.xlu0 %1090 }
 0xedc   :  { %v1102_v44 = vsel %vm267_vm4, %v1091_v20, %v1709_v55 }
 0xedd   :  { %v1109_v28 = vcombine.low %v1101_v22, %v1102_v44 }
 0xedf   :  { %v1099_v50 = vpop.permute.xlu0 %1098  ;;  %v1117_v52 = vrot.slane %v1109_v28, %v1116_v11 }
 0xee4   :  { %v1411_v46 = vpop.eup %1410 }
 0xee5   :  { %v1085_v36 = vmul.f32 %v1411_v46, %v1409_v8 }
 0xee7   :  { %v1086_v49 = vsel %vm250_vm2, %v1085_v36, 0.0  ;;  %v1087_v16 = vsel %vm250_vm2, %v1085_v36, %v984_v21 }
 0xee8   :  { %v1104_v45 = vsel %vm267_vm4, %v1099_v50, %v1086_v49  ;;  %1129 = vrot.lane.b32.xlu1 %v1087_v16, %s1438_s16 }
 0xee9   :  { %v1110_v55 = vcombine.low %v1103_v1, %v1104_v45 }
 0xeeb   :  { %v1124_v53 = vrot.slane %v1110_v55, %v1116_v11 }
 0xeed   :  { %v1125_v54 = vcombine.low %v1117_v52, %v1124_v53 }
 0xeef   :  { %1127 = vst [vmem:[%s1793_s5] sm:$0xff] %v1125_v54 }
 0xf5a   :  { %v1130_v35 = vpop.permute.xlu1 %1129 }
 0xf5b   :  { %1133 = vst.msk [vmem:[#allocation2] sm:$0x3] %vm1132_vm3, %v1130_v35 }
 0xf5c   :  { %1423 = shalt.err (!%p1420_p4)
}
 0xf5d   :  { %s1424_s23 = scalar_lea.hbm %s1794_s6, 32 }
 0xf5e   :  { %p1425_p5 = scmp.ne.s32.totalorder %s1794_s6, %s1424_s23  ;;  %p1428_p6 = scmp.lt.u32.totalorder %s1424_s23, %s1794_s6 }
 0xf60   :  { %p1430_p7 = pnand %p1428_p6, %p1425_p5 }
 0xf62   :  { %1433 = shalt.err (!%p1430_p7)
}
 0xf63   :  { %1145 = dma.vmem_to_hbm [thread:$0]  %s1143_s19, 32, %s1794_s6, [#allocation3]  }
 0xf64   :  { %1434 = dma.done.wait [#allocation3], 32  }
 0xf65   :  { %1435 = vsyncadd [#allocation3], 4294967264 }
 0xf66   :  { %1151 = vsyncpa [#allocation3], 1 }

</bundles_post_ra>
